<compile_context>
chip_gen: v5e
topology: v5e:2x2
jax: 0.10.0
libtpu: 0.0.40
codegen_flags: <defaults>
</compile_context>

<pallas_src>
import jax
import jax.numpy as jnp
from jax.experimental import pallas as pl
from jax.experimental.pallas import tpu as pltpu


def _round_up(x: int, m: int) -> int:
    return (x + m - 1) // m * m


def _linear_kernel(x_ref, wt_ref, b_ref, o_ref):
    # x_ref : (TB, K)   input batch tile
    # wt_ref: (K, N)    pre-transposed weight (in, out), VMEM-resident
    # b_ref : (1, N)    bias row, VMEM-resident
    # o_ref : (TB, N)   output tile
    y = jnp.dot(x_ref[...], wt_ref[...], preferred_element_type=jnp.float32)
    y = y + b_ref[...]
    if y.dtype != o_ref.dtype:  # static; no-op cast elided for pure-f32 path
        y = y.astype(o_ref.dtype)
    o_ref[...] = y


def prepare_linear_params(weight, bias):
    """One-time parameter prep (call at init, NOT per forward).

    weight: (out_features, in_features)  -- PyTorch nn.Linear layout
    bias  : (out_features,)
    Returns (w_t, bias2d) in the kernel's layout: (in, out) and (1, out).
    """
    w_t = jnp.asarray(weight).T                      # (in, out)
    bias2d = jnp.asarray(bias).reshape(1, -1)        # (1, out)
    return w_t, bias2d


def _choose_tile(B: int, block_b: int) -> int:
    if B < 16:
        # Single tile covering the whole batch; equals the full dim, so any B
        # (even non-multiple-of-8) is a legal block shape.
        return B
    tb = min(block_b, _round_up(B, 8))
    # Keep >= 2 grid steps so megacore (v7x: 2 TensorCores) can split the
    # "parallel" batch axis; each tile stays a multiple of 8 sublanes.
    if pl.cdiv(B, tb) < 2:
        tb = _round_up(pl.cdiv(B, 2), 8)
    return tb


def linear_pallas(x, w_t, bias2d, *, block_b: int = 1024):
    """y = x @ w_t + bias, matching torch.nn.Linear(in, out) semantics.

    x     : (..., in_features)
    w_t   : (in_features, out_features)   -- pre-transposed once at init
    bias2d: (1, out_features)
    """
    in_f, out_f = w_t.shape
    lead_shape = x.shape[:-1]
    x2 = x.reshape(-1, in_f)
    B = x2.shape[0]

    tb = _choose_tile(B, block_b)
    grid = (pl.cdiv(B, tb),)

    cost = pl.CostEstimate(
        flops=2 * B * in_f * out_f,
        transcendentals=0,
        bytes_accessed=4 * (B * in_f + in_f * out_f + out_f + B * out_f),
    )

    y = pl.pallas_call(
        _linear_kernel,
        out_shape=jax.ShapeDtypeStruct((B, out_f), x.dtype),
        grid_spec=pltpu.PrefetchScalarGridSpec(
            num_scalar_prefetch=0,
            grid=grid,
            in_specs=[
                # x tile advances with the batch grid (ragged final block OK).
                pl.BlockSpec((tb, in_f), lambda i: (i, 0)),
                # weight / bias stay resident in VMEM across all batch tiles.
                pl.BlockSpec((in_f, out_f), lambda i: (0, 0)),
                pl.BlockSpec((1, out_f), lambda i: (0, 0)),
            ],
            out_specs=pl.BlockSpec((tb, out_f), lambda i: (i, 0)),
        ),
        compiler_params=pltpu.CompilerParams(
            dimension_semantics=("parallel",),
        ),
        cost_estimate=cost,
    )(x2, w_t, bias2d)

    return y.reshape(*lead_shape, out_f)


if __name__ == "__main__":
    key = jax.random.PRNGKey(0)
    k_x, k_w, k_b = jax.random.split(key, 3)

    B, IN, OUT = 8, 64, 64

    # Deterministic parameter init (PyTorch nn.Linear shapes: W (out,in), b (out,))
    bound = 1.0 / (IN ** 0.5)
    weight = jax.random.uniform(k_w, (OUT, IN), jnp.float32, -bound, bound)
    bias = jax.random.uniform(k_b, (OUT,), jnp.float32, -bound, bound)

    x = jax.random.normal(k_x, (B, IN), jnp.float32)

    # One-time parameter prep (hoisted out of the forward path).
    w_t, bias2d = prepare_linear_params(weight, bias)

    y = linear_pallas(x, w_t, bias2d)
    jax.block_until_ready(y)

    # Correctness check against plain JAX reference (nn.Linear semantics).
    y_ref = x @ weight.T + bias
    assert y.shape == (B, OUT)
    assert jnp.allclose(y, y_ref, atol=1e-5, rtol=1e-5), "mismatch vs reference"

    print("KERNEL_OK")
</pallas_src>

<mosaic_0001>
module attributes {stable_mosaic.version = 11 : i64} {
  func.func @_linear_kernel(%arg0: i32, %arg1: memref<8x64xf32, #tpu.memory_space<vmem>>, %arg2: memref<64x64xf32, #tpu.memory_space<vmem>>, %arg3: memref<1x64xf32, #tpu.memory_space<vmem>>, %arg4: memref<8x64xf32, #tpu.memory_space<vmem>>) attributes {dimension_semantics = [#tpu.dimension_semantics<parallel>], iteration_bounds = array<i64: 1>, scalar_prefetch = 0 : i64, scratch_operands = 0 : i64, tpu.core_type = #tpu.core_type<tc>, window_params = [{transform_indices = @transform_0, window_bounds = array<i64: 8, 64>}, {pipeline_mode = #tpu.pipeline_mode<synchronous>, transform_indices = @transform_1, window_bounds = array<i64: 64, 64>}, {pipeline_mode = #tpu.pipeline_mode<synchronous>, transform_indices = @transform_2, window_bounds = array<i64: 1, 64>}, {transform_indices = @transform_3, window_bounds = array<i64: 8, 64>}]} {
    %c0 = arith.constant 0 : index
    %c0_0 = arith.constant 0 : index
    %0 = vector.load %arg1[%c0, %c0_0] : memref<8x64xf32, #tpu.memory_space<vmem>>, vector<8x64xf32>
    %c0_1 = arith.constant 0 : index
    %c0_2 = arith.constant 0 : index
    %1 = vector.load %arg2[%c0_1, %c0_2] : memref<64x64xf32, #tpu.memory_space<vmem>>, vector<64x64xf32>
    %cst = arith.constant dense<0.000000e+00> : vector<8x64xf32>
    %2 = tpu.matmul %0, %1, %cst {dimension_numbers = #tpu.dot_dimension_numbers<[1], [0], [0], [1], [0, 0, 1, 1], [], []>} : vector<8x64xf32>, vector<64x64xf32>, vector<8x64xf32> -> vector<8x64xf32>
    %c0_3 = arith.constant 0 : index
    %c0_4 = arith.constant 0 : index
    %3 = vector.load %arg3[%c0_3, %c0_4] : memref<1x64xf32, #tpu.memory_space<vmem>>, vector<1x64xf32>
    %4 = vector.broadcast %3 : vector<1x64xf32> to vector<8x64xf32>
    %5 = arith.addf %2, %4 : vector<8x64xf32>
    %c0_5 = arith.constant 0 : index
    %c0_6 = arith.constant 0 : index
    %6 = vector.load %arg4[%c0_5, %c0_6] : memref<8x64xf32, #tpu.memory_space<vmem>>, vector<8x64xf32>
    tpu.vector_store %arg4[%c0_5, %c0_6], %5 {strides = array<i32>} : memref<8x64xf32, #tpu.memory_space<vmem>>, vector<8x64xf32>,
    return
  }
  func.func @transform_0(%arg0: i32) -> (i32, i32) {
    %c0_i32 = arith.constant 0 : i32
    %c0_i32_0 = arith.constant 0 : i32
    return %arg0, %c0_i32 : i32, i32
  }
  func.func @transform_1(%arg0: i32) -> (i32, i32) {
    %c0_i32 = arith.constant 0 : i32
    %c0_i32_0 = arith.constant 0 : i32
    %c0_i32_1 = arith.constant 0 : i32
    return %c0_i32, %c0_i32_0 : i32, i32
  }
  func.func @transform_2(%arg0: i32) -> (i32, i32) {
    %c0_i32 = arith.constant 0 : i32
    %c0_i32_0 = arith.constant 0 : i32
    %c0_i32_1 = arith.constant 0 : i32
    return %c0_i32, %c0_i32_0 : i32, i32
  }
  func.func @transform_3(%arg0: i32) -> (i32, i32) {
    %c0_i32 = arith.constant 0 : i32
    %c0_i32_0 = arith.constant 0 : i32
    return %arg0, %c0_i32 : i32, i32
  }
}

</mosaic_0001>

<bundles_post_ra>
// kernel: tpu_custom_call.1
= control target key start
LH: loop header
LB: loop body
LE: loop exit
PB: predicated region body
PF: predicated region fallthrough
CT: control target
= control target key end

     0   :  { %8 = vsyncpa [#allocation3], 0  ;;  %s223_s0 = inlined_call_operand.hbm [shape: f32[8,64], index: 0, kind: input, shape index: {}]   ;;  %s224_s1 = inlined_call_operand.hbm [shape: f32[64,64], index: 1, kind: input, shape index: {}]   ;;  %s225_s2 = inlined_call_operand.vmem [shape: f32[1,64], index: 2, kind: input, shape index: {}]   ;;  %s226_s3 = inlined_call_operand.hbm [shape: f32[8,64], index: 3, kind: output, shape index: {}]  }
   0x1   :  { %9 = vsyncpa [#allocation6], 0 }
   0x2   :  { %10 = vsyncpa [#allocation4], 0  ;;  %s16_s14 = sshll.u32 %s223_s0, 4  ;;  %s186_s15 = smov [#allocation2]   ;;  %s17_s14 = int_to_ptr.hbm [resolvable:$true] %s16_s14 }
   0x3   :  { %s18_s16 = sshll.u32 %s186_s15, 4  ;;  %s26_s19 = sshll.u32 %s224_s1, 4  ;;  %s19_s16 = int_to_ptr.vmem [resolvable:$true] %s18_s16  ;;  %s27_s19 = int_to_ptr.hbm [resolvable:$true] %s26_s19 }
   0x4   :  { %21 = dma.hbm_to_vmem [thread:$0]  %s17_s14, 128, %s19_s16, [#allocation3]  }
   0x5   :  { %s187_s20 = smov [#allocation5]   ;;  %s188_s22 = smov 128  }
   0x6   :  { %s28_s21 = sshll.u32 %s187_s20, 4  ;;  %s189_s23 = smov 8   ;;  %s29_s21 = int_to_ptr.vmem [resolvable:$true] %s28_s21 }
   0x7   :  { %34 = dma.hbm_to_vmem [thread:$0]  %s27_s19, 1024, %s29_s21, [#allocation6], %s188_s22, %s188_s22, %s189_s23  }
   0x8   :  { %180 = dma.done.wait [#allocation3], 128  }
   0x9   :  { %181 = vsyncadd [#allocation3], 4294967168 }
   0xa   :  { %182 = dma.done.wait [#allocation6], 1024  }
   0xb   :  { %183 = vsyncadd [#allocation6], 4294966272  ;;  %v53_v0 = vld [vmem:[#allocation5 + $0x38] sm:$0xff]  ;;  %v52_v1 = vld [vmem:[#allocation5 + $0x30] sm:$0xff]  ;;  %vm58_vm0 = vcmask 523264   ;;  %s190_s24 = smov [#allocation7]  }
   0xc   :  { %70 = vmatpush.msra.mxu0 %v53_v0  ;;  %v51_v2 = vld [vmem:[#allocation5 + $0x28] sm:$0xff]  ;;  %v50_v3 = vld [vmem:[#allocation5 + $0x20] sm:$0xff]  ;;  %v49_v4 = vld [vmem:[#allocation5 + $0x18] sm:$0xff]  ;;  %s88_s25 = sshll.u32 %s190_s24, 4  ;;  %s90_s28 = sshll.u32 %s226_s3, 4  ;;  %s89_s25 = int_to_ptr.vmem [resolvable:$true] %s88_s25  ;;  %s91_s28 = int_to_ptr.hbm [resolvable:$true] %s90_s28 }
   0xd   :  { %v48_v5 = vld [vmem:[#allocation5 + $0x10] sm:$0xff]  ;;  %v47_v6 = vld [vmem:[#allocation5 + $0x8] sm:$0xff]  ;;  %v46_v7 = vld [vmem:[#allocation5] sm:$0xff] }
   0xe   :  { %71 = vmatpush.msra.mxu0 %v52_v1  ;;  %v45_v8 = vld [vmem:[#allocation2] sm:$0xff] }
   0xf   :  { %v107_v9 = vld [vmem:[%s225_s2] ss:$0 sm:$0xff] }
  0x10   :  { %72 = vmatpush.msra.mxu0 %v51_v2 }
  0x12   :  { %73 = vmatpush.msra.mxu0 %v50_v3 }
  0x14   :  { %74 = vmatpush.msra.mxu0 %v49_v4 }
  0x16   :  { %75 = vmatpush.msra.mxu0 %v48_v5 }
  0x18   :  { %76 = vmatpush.msra.mxu0 %v47_v6 }
  0x1a   :  { %77 = vmatpush.msra.mxu0 %v46_v7 }
  0x1b   :  { %101 = vmatmul.msk.f32.vlgmr.msra.gmra.mxu0 %vm58_vm0, %v45_v8 }
  0x98   :  { %v79_v10 = vpop.f32.mrf.mxu0 }
  0x99   :  { %v80_v11 = vadd.f32 %v107_v9, %v79_v10 }
  0x9b   :  { %82 = vst.msk [vmem:[#allocation7] sm:$0xff] %vm58_vm0, %v80_v11 }
  0x9c   :  { %93 = dma.vmem_to_hbm [thread:$0]  %s89_s25, 128, %s91_s28, [#allocation4]  }
  0x9d   :  { %184 = dma.done.wait [#allocation4], 128  }
  0x9e   :  { %185 = vsyncadd [#allocation4], 4294967168 }
  0x9f   :  { %98 = vsyncpa [#allocation3], 1 }
  0xa0   :  { %99 = vsyncpa [#allocation6], 1 }
  0xa1   :  { %100 = vsyncpa [#allocation4], 1 }

</bundles_post_ra>
